<compile_context>
chip_gen: v7x
topology: tpu7x:2x2x1
jax: 0.10.0
libtpu: 0.0.40
codegen_flags: <defaults>
</compile_context>

<pallas_src>
import functools

import jax
import jax.numpy as jnp
from jax import lax
from jax.experimental import pallas as pl
from jax.experimental.pallas import tpu as pltpu


def _round_up(x, m):
    return ((x + m - 1) // m) * m


# ---------------------------------------------------------------------------
# Kernel 1 (fused DIST part): temperature softmax + inter-class Pearson
# (over classes, per batch tile) + intra-class Pearson (over batch, finished
# from running column moments on the last tile).  Inputs are streamed raw;
# the (possibly partial) last batch tile is masked in-kernel.
# ---------------------------------------------------------------------------
def _dist_kernel(ls_ref, lt_ref, o_ref,
                 inter_acc, s_sum, t_sum, st_sum, ss_sum, tt_sum, *,
                 nb, nc, inv_t, t2, beta, gamma):
    bi = pl.program_id(0)

    @pl.when(bi == 0)
    def _():
        inter_acc[...] = jnp.zeros_like(inter_acc)
        s_sum[...] = jnp.zeros_like(s_sum)
        t_sum[...] = jnp.zeros_like(t_sum)
        st_sum[...] = jnp.zeros_like(st_sum)
        ss_sum[...] = jnp.zeros_like(ss_sum)
        tt_sum[...] = jnp.zeros_like(tt_sum)

    xs = ls_ref[...].astype(jnp.float32) * inv_t             # (tb, nc)
    xt = lt_ref[...].astype(jnp.float32) * inv_t
    tb = xs.shape[0]

    # row-validity mask for the (possibly partial) last batch tile
    row_ok = (lax.broadcasted_iota(jnp.int32, (tb, 1), 0) + bi * tb) < nb
    neg = jnp.float32(-1e30)
    xs = jnp.where(row_ok, xs, neg)
    xt = jnp.where(row_ok, xt, neg)

    # temperature softmax over classes; invalid rows become benign uniform
    # rows and are zeroed right after (no NaN path).
    es = jnp.exp(xs - jnp.max(xs, axis=1, keepdims=True))
    et = jnp.exp(xt - jnp.max(xt, axis=1, keepdims=True))
    ys = es * pl.reciprocal(jnp.sum(es, axis=1, keepdims=True))
    yt = et * pl.reciprocal(jnp.sum(et, axis=1, keepdims=True))
    ys = jnp.where(row_ok, ys, 0.0)
    yt = jnp.where(row_ok, yt, 0.0)

    inv_nc = jnp.float32(1.0 / nc)
    eps = jnp.float32(1e-8)

    # ---- inter-class relation: Pearson across classes, summed over rows ----
    # softmax rows sum to 1 over classes -> per-row class mean is exactly 1/nc.
    a = jnp.where(row_ok, ys - inv_nc, 0.0)
    b = jnp.where(row_ok, yt - inv_nc, 0.0)
    num = jnp.sum(a * b, axis=1, keepdims=True)
    den = (jnp.sqrt(jnp.sum(a * a, axis=1, keepdims=True)) *
           jnp.sqrt(jnp.sum(b * b, axis=1, keepdims=True)) + eps)
    corr = jnp.where(row_ok, num / den, 0.0)                  # (tb, 1)
    inter_acc[...] += jnp.sum(corr, keepdims=True)

    # ---- intra-class relation: running column moments over the batch ----
    s_sum[...] += jnp.sum(ys, axis=0, keepdims=True)
    t_sum[...] += jnp.sum(yt, axis=0, keepdims=True)
    st_sum[...] += jnp.sum(ys * yt, axis=0, keepdims=True)
    ss_sum[...] += jnp.sum(ys * ys, axis=0, keepdims=True)
    tt_sum[...] += jnp.sum(yt * yt, axis=0, keepdims=True)

    @pl.when(bi == pl.num_programs(0) - 1)
    def _():
        inv_nb = jnp.float32(1.0 / nb)
        sx, sy = s_sum[...], t_sum[...]
        cov = st_sum[...] - sx * sy * inv_nb
        vx = jnp.maximum(ss_sum[...] - sx * sx * inv_nb, 0.0)
        vy = jnp.maximum(tt_sum[...] - sy * sy * inv_nb, 0.0)
        den0 = jnp.sqrt(vx) * jnp.sqrt(vy) + eps
        corr0 = cov / den0                                    # (1, nc)
        intra = 1.0 - jnp.sum(corr0, keepdims=True) * inv_nc
        inter = 1.0 - inter_acc[...] * inv_nb
        res = t2 * (beta * inter + gamma * intra)             # (1, 1)
        o_ref[0] = res[0, 0]


def dist_relation_loss(logits_s, logits_t, *, temperature, beta, gamma,
                       tile_slab_bytes=2 * 1024 * 1024):
    b, c = logits_s.shape
    # Batch tile: multiple of 8 rows, sized so a (tb, C) f32 slab stays small
    # enough that double-buffered inputs + in-kernel f32 temporaries stay well
    # inside scoped VMEM on every generation (incl. v7x's 64 MiB).
    tb_cap = max(8, (tile_slab_bytes // (4 * c) // 8) * 8)
    tb = b if b <= tb_cap else tb_cap
    grid = (pl.cdiv(b, tb),)

    kern = functools.partial(
        _dist_kernel, nb=b, nc=c,
        inv_t=1.0 / temperature, t2=temperature * temperature,
        beta=beta, gamma=gamma)

    out = pl.pallas_call(
        kern,
        out_shape=jax.ShapeDtypeStruct((1,), jnp.float32),
        grid=grid,
        in_specs=[pl.BlockSpec((tb, c), lambda i: (i, 0)),
                  pl.BlockSpec((tb, c), lambda i: (i, 0))],
        out_specs=pl.BlockSpec(memory_space=pltpu.SMEM),
        scratch_shapes=[pltpu.VMEM((1, 1), jnp.float32),   # inter accumulator
                        pltpu.VMEM((1, c), jnp.float32),   # sum ys
                        pltpu.VMEM((1, c), jnp.float32),   # sum yt
                        pltpu.VMEM((1, c), jnp.float32),   # sum ys*yt
                        pltpu.VMEM((1, c), jnp.float32),   # sum ys^2
                        pltpu.VMEM((1, c), jnp.float32)],  # sum yt^2
        compiler_params=pltpu.CompilerParams(
            dimension_semantics=("arbitrary",),   # accumulates across batch tiles
            vmem_limit_bytes=48 * 1024 * 1024),
    )(logits_s, logits_t)
    return out[0]


# ---------------------------------------------------------------------------
# Kernel 2: RKD angle loss via the Gram-expansion identity.
# Grid = K-chunks of the (zero-padded) feature dim: accumulate
#   Gs = S @ S^T, Gt = T @ T^T  in VMEM scratch; on the last step rebuild each
# anchor's angle Gram on the VPU from Gram entries only:
#   <x_j-x_i, x_k-x_i> = G[j,k] - G[j,i] - G[i,k] + G[i,i]
#   ||x_j-x_i||^2      = G[j,j] - 2 G[j,i] + G[i,i]
# Per anchor, row i of G is a direct sublane slice of the scratch ref, G[i,i]
# comes from the precomputed diagonal, and only the column G[:,i] needs one
# masked lane reduce per tensor.  Anchor row/column entries are zeroed through
# the inverse-distance vectors (exactly 0 in the reference); the mean still
# divides by B^3.
# ---------------------------------------------------------------------------
def _angle_kernel(s_ref, t_ref, o_ref, gs_acc, gt_acc, *, nb, inv_total):
    k = pl.program_id(0)

    @pl.when(k == 0)
    def _():
        gs_acc[...] = jnp.zeros_like(gs_acc)
        gt_acc[...] = jnp.zeros_like(gt_acc)

    s = s_ref[...].astype(jnp.float32)                        # (BP, TK)
    t = t_ref[...].astype(jnp.float32)
    dn = (((1,), (1,)), ((), ()))                             # contract feature dim
    gs_acc[...] += lax.dot_general(s, s, dn, preferred_element_type=jnp.float32)
    gt_acc[...] += lax.dot_general(t, t, dn, preferred_element_type=jnp.float32)

    @pl.when(k == pl.num_programs(0) - 1)
    def _():
        gs = gs_acc[...]                                      # (BP, BP)
        gt = gt_acc[...]
        bp = gs.shape[0]
        row = lax.broadcasted_iota(jnp.int32, (bp, bp), 0)
        col = lax.broadcasted_iota(jnp.int32, (bp, bp), 1)
        eye = row == col
        in_range = (row < nb) & (col < nb)
        sub_iota = lax.broadcasted_iota(jnp.int32, (bp, 1), 0)
        lane_iota = lax.broadcasted_iota(jnp.int32, (1, bp), 1)
        eps2 = jnp.float32(1e-24)

        # diag(G) as a column (over j) and as a row (over k) -- computed once.
        dgs_c = jnp.sum(jnp.where(eye, gs, 0.0), axis=1, keepdims=True)
        dgt_c = jnp.sum(jnp.where(eye, gt, 0.0), axis=1, keepdims=True)
        dgs_r = jnp.sum(jnp.where(eye, gs, 0.0), axis=0, keepdims=True)
        dgt_r = jnp.sum(jnp.where(eye, gt, 0.0), axis=0, keepdims=True)

        def per_anchor(i, acc):
            sub_eq = sub_iota == i                            # (bp, 1)
            lane_eq = lane_iota == i                          # (1, bp)
            # row i of G straight from the scratch ref (dynamic sublane slice)
            gs_ri = gs_acc[pl.ds(i, 1), :]                    # (1, bp) = G[i, k]
            gt_ri = gt_acc[pl.ds(i, 1), :]
            # column i of G: one masked lane reduce per tensor (G symmetric)
            gs_ci = jnp.sum(jnp.where(lane_eq, gs, 0.0), axis=1, keepdims=True)
            gt_ci = jnp.sum(jnp.where(lane_eq, gt, 0.0), axis=1, keepdims=True)
            # G[i, i] from the precomputed diagonal
            gs_ii = jnp.sum(jnp.where(sub_eq, dgs_c, 0.0), keepdims=True)
            gt_ii = jnp.sum(jnp.where(sub_eq, dgt_c, 0.0), keepdims=True)

            # 1/||x_j - x_i|| along rows (j) and columns (k); the anchor entry
            # is forced to 0, matching F.normalize of a zero difference vector.
            inv_s_j = lax.rsqrt(jnp.maximum(dgs_c - 2.0 * gs_ci + gs_ii, eps2))
            inv_s_k = lax.rsqrt(jnp.maximum(dgs_r - 2.0 * gs_ri + gs_ii, eps2))
            inv_t_j = lax.rsqrt(jnp.maximum(dgt_c - 2.0 * gt_ci + gt_ii, eps2))
            inv_t_k = lax.rsqrt(jnp.maximum(dgt_r - 2.0 * gt_ri + gt_ii, eps2))
            inv_s_j = jnp.where(sub_eq, 0.0, inv_s_j)
            inv_t_j = jnp.where(sub_eq, 0.0, inv_t_j)
            inv_s_k = jnp.where(lane_eq, 0.0, inv_s_k)
            inv_t_k = jnp.where(lane_eq, 0.0, inv_t_k)

            ang_s = (gs - gs_ci - gs_ri + gs_ii) * (inv_s_j * inv_s_k)
            ang_t = (gt - gt_ci - gt_ri + gt_ii) * (inv_t_j * inv_t_k)

            diff = ang_s - ang_t
            ad = jnp.abs(diff)
            hub = jnp.where(ad < 1.0, 0.5 * diff * diff, ad - 0.5)  # smooth_l1, beta=1
            hub = jnp.where(in_range, hub, 0.0)
            return acc + jnp.sum(hub, axis=1, keepdims=True)   # (bp, 1) carry

        acc = lax.fori_loop(0, nb, per_anchor, jnp.zeros((bp, 1), jnp.float32))
        o_ref[0] = jnp.sum(acc) * inv_total


def angle_loss(student, teacher, *, vmem_budget_bytes=32 * 1024 * 1024,
               max_tile_k=32768):
    b, d = student.shape
    bp = _round_up(b, 8)

    # Mean-centre the features (angle loss is translation-invariant); this
    # conditions the Gram-expansion cancellation G[j,j] - 2 G[j,i] + G[i,i].
    s32 = student.astype(jnp.float32)
    t32 = teacher.astype(jnp.float32)
    s_c = (s32 - jnp.mean(s32, axis=0, keepdims=True)).astype(student.dtype)
    t_c = (t32 - jnp.mean(t32, axis=0, keepdims=True)).astype(teacher.dtype)

    # K tile: lane-dense multiple of 128, sized so (2 inputs x 2 pipeline
    # buffers) of (bp, tile_k) blocks plus the two (bp, bp) f32 Gram scratch
    # buffers stay inside the VMEM budget (kept v7x-safe).
    isz = max(jnp.dtype(student.dtype).itemsize, jnp.dtype(teacher.dtype).itemsize)
    gram_bytes = 2 * bp * bp * 4
    tile_budget = max(vmem_budget_bytes - gram_bytes, 4 * 1024 * 1024)
    cap = max(128, (tile_budget // (2 * 2 * isz * bp) // 128) * 128)
    tile_k = min(_round_up(d, 128), min(cap, max_tile_k))
    dp = _round_up(d, tile_k)                 # zero-padding D is numerically safe

    # pad in the native dtype; the kernel casts to f32 on the fly.
    s = jnp.pad(s_c, ((0, bp - b), (0, dp - d)))
    t = jnp.pad(t_c, ((0, bp - b), (0, dp - d)))

    out = pl.pallas_call(
        functools.partial(_angle_kernel, nb=b, inv_total=1.0 / float(b) ** 3),
        grid=(dp // tile_k,),
        out_shape=jax.ShapeDtypeStruct((1,), jnp.float32),
        in_specs=[pl.BlockSpec((bp, tile_k), lambda k: (0, k)),
                  pl.BlockSpec((bp, tile_k), lambda k: (0, k))],
        out_specs=pl.BlockSpec(memory_space=pltpu.SMEM),
        scratch_shapes=[pltpu.VMEM((bp, bp), jnp.float32),
                        pltpu.VMEM((bp, bp), jnp.float32)],
        compiler_params=pltpu.CompilerParams(
            dimension_semantics=("arbitrary",),            # K is a reduction axis
            vmem_limit_bytes=48 * 1024 * 1024),            # <= v7x 64 MiB VMEM
    )(s, t)
    return out[0]


# ---------------------------------------------------------------------------
# RDIST forward (scalar glue in plain JAX)
# ---------------------------------------------------------------------------
def rdist_loss(logits_s, logits_t, f_s, f_t, *, wa=10.0, beta=1.0,
               gamma=1.0, temperature=4.0):
    dist_part = dist_relation_loss(logits_s, logits_t, temperature=temperature,
                                   beta=beta, gamma=gamma)
    student = f_s.reshape(f_s.shape[0], -1)
    teacher = f_t.reshape(f_t.shape[0], -1)
    loss_a = angle_loss(student, teacher)
    return dist_part + wa * loss_a


# ---------------------------------------------------------------------------
# Pure-JAX reference for validation
# ---------------------------------------------------------------------------
def _reference(logits_s, logits_t, f_s, f_t, wa=10.0, beta=1.0, gamma=1.0,
               T=4.0):
    y_s = jax.nn.softmax(logits_s / T, axis=1)
    y_t = jax.nn.softmax(logits_t / T, axis=1)

    def pearson_loss(a, b):
        a = a - a.mean(1, keepdims=True)
        b = b - b.mean(1, keepdims=True)
        c = (a * b).sum(1) / (jnp.linalg.norm(a, axis=1) *
                              jnp.linalg.norm(b, axis=1) + 1e-8)
        return 1.0 - c.mean()

    inter = T * T * pearson_loss(y_s, y_t)
    intra = T * T * pearson_loss(y_s.T, y_t.T)

    st = f_s.reshape(f_s.shape[0], -1)
    te = f_t.reshape(f_t.shape[0], -1)

    def angles(x):
        d = x[None, :, :] - x[:, None, :]
        n = d / jnp.maximum(jnp.linalg.norm(d, axis=2, keepdims=True), 1e-12)
        return jnp.einsum('ijd,ikd->ijk', n, n).reshape(-1)

    sa, ta = angles(st), angles(te)
    diff = sa - ta
    ad = jnp.abs(diff)
    la = jnp.mean(jnp.where(ad < 1.0, 0.5 * diff * diff, ad - 0.5))
    return beta * inter + gamma * intra + wa * la


if __name__ == "__main__":
    key = jax.random.PRNGKey(0)
    k1, k2, k3, k4 = jax.random.split(key, 4)
    B, C = 8, 16           # batch, classes
    Cf, H, W = 4, 4, 4     # feature maps (NCHW) -> D = 64

    logits_s = jax.random.normal(k1, (B, C), jnp.float32)
    logits_t = jax.random.normal(k2, (B, C), jnp.float32)
    f_s = jax.random.normal(k3, (B, Cf, H, W), jnp.float32)
    f_t = jax.random.normal(k4, (B, Cf, H, W), jnp.float32)

    loss = jax.block_until_ready(rdist_loss(logits_s, logits_t, f_s, f_t))
    ref = jax.block_until_ready(_reference(logits_s, logits_t, f_s, f_t))

    assert bool(jnp.isfinite(loss)), "loss not finite"
    assert bool(jnp.allclose(loss, ref, rtol=1e-3, atol=1e-3)), (loss, ref)
    print("KERNEL_OK")
</pallas_src>

<mosaic_0001>
module attributes {stable_mosaic.version = 11 : i64} {
  func.func @_dist_kernel(%arg0: i32, %arg1: memref<8x16xf32, #tpu.memory_space<vmem>>, %arg2: memref<8x16xf32, #tpu.memory_space<vmem>>, %arg3: memref<1xf32, #tpu.memory_space<smem>>, %arg4: memref<1x1xf32, #tpu.memory_space<vmem>>, %arg5: memref<1x16xf32, #tpu.memory_space<vmem>>, %arg6: memref<1x16xf32, #tpu.memory_space<vmem>>, %arg7: memref<1x16xf32, #tpu.memory_space<vmem>>, %arg8: memref<1x16xf32, #tpu.memory_space<vmem>>, %arg9: memref<1x16xf32, #tpu.memory_space<vmem>>) attributes {dimension_semantics = [#tpu.dimension_semantics<arbitrary>], iteration_bounds = array<i64: 1>, scalar_prefetch = 0 : i64, scratch_operands = 6 : i64, tpu.core_type = #tpu.core_type<tc>, window_params = [{transform_indices = @transform_0, window_bounds = array<i64: 8, 16>}, {transform_indices = @transform_1, window_bounds = array<i64: 8, 16>}, {transform_indices = @transform_2, window_bounds = array<i64: 1>}]} {
    %c0_i32 = arith.constant 0 : i32
    %0 = arith.cmpi eq, %arg0, %c0_i32 : i32
    %1 = arith.extui %0 : i1 to i32
    %c0_i32_0 = arith.constant 0 : i32
    %2 = arith.cmpi ne, %1, %c0_i32_0 : i32
    scf.if %2 {
      %cst_57 = arith.constant 0.000000e+00 : f32
      %119 = vector.broadcast %cst_57 : f32 to vector<1x1xf32>
      %c0_58 = arith.constant 0 : index
      %c0_59 = arith.constant 0 : index
      %120 = vector.load %arg4[%c0_58, %c0_59] : memref<1x1xf32, #tpu.memory_space<vmem>>, vector<1x1xf32>
      tpu.vector_store %arg4[%c0_58, %c0_59], %119 {strides = array<i32>} : memref<1x1xf32, #tpu.memory_space<vmem>>, vector<1x1xf32>,
      %cst_60 = arith.constant 0.000000e+00 : f32
      %121 = vector.broadcast %cst_60 : f32 to vector<1x16xf32>
      %c0_61 = arith.constant 0 : index
      %c0_62 = arith.constant 0 : index
      %122 = vector.load %arg5[%c0_61, %c0_62] : memref<1x16xf32, #tpu.memory_space<vmem>>, vector<1x16xf32>
      tpu.vector_store %arg5[%c0_61, %c0_62], %121 {strides = array<i32>} : memref<1x16xf32, #tpu.memory_space<vmem>>, vector<1x16xf32>,
      %cst_63 = arith.constant 0.000000e+00 : f32
      %123 = vector.broadcast %cst_63 : f32 to vector<1x16xf32>
      %c0_64 = arith.constant 0 : index
      %c0_65 = arith.constant 0 : index
      %124 = vector.load %arg6[%c0_64, %c0_65] : memref<1x16xf32, #tpu.memory_space<vmem>>, vector<1x16xf32>
      tpu.vector_store %arg6[%c0_64, %c0_65], %123 {strides = array<i32>} : memref<1x16xf32, #tpu.memory_space<vmem>>, vector<1x16xf32>,
      %cst_66 = arith.constant 0.000000e+00 : f32
      %125 = vector.broadcast %cst_66 : f32 to vector<1x16xf32>
      %c0_67 = arith.constant 0 : index
      %c0_68 = arith.constant 0 : index
      %126 = vector.load %arg7[%c0_67, %c0_68] : memref<1x16xf32, #tpu.memory_space<vmem>>, vector<1x16xf32>
      tpu.vector_store %arg7[%c0_67, %c0_68], %125 {strides = array<i32>} : memref<1x16xf32, #tpu.memory_space<vmem>>, vector<1x16xf32>,
      %cst_69 = arith.constant 0.000000e+00 : f32
      %127 = vector.broadcast %cst_69 : f32 to vector<1x16xf32>
      %c0_70 = arith.constant 0 : index
      %c0_71 = arith.constant 0 : index
      %128 = vector.load %arg8[%c0_70, %c0_71] : memref<1x16xf32, #tpu.memory_space<vmem>>, vector<1x16xf32>
      tpu.vector_store %arg8[%c0_70, %c0_71], %127 {strides = array<i32>} : memref<1x16xf32, #tpu.memory_space<vmem>>, vector<1x16xf32>,
      %cst_72 = arith.constant 0.000000e+00 : f32
      %129 = vector.broadcast %cst_72 : f32 to vector<1x16xf32>
      %c0_73 = arith.constant 0 : index
      %c0_74 = arith.constant 0 : index
      %130 = vector.load %arg9[%c0_73, %c0_74] : memref<1x16xf32, #tpu.memory_space<vmem>>, vector<1x16xf32>
      tpu.vector_store %arg9[%c0_73, %c0_74], %129 {strides = array<i32>} : memref<1x16xf32, #tpu.memory_space<vmem>>, vector<1x16xf32>,
    } else {
    }
    %c0 = arith.constant 0 : index
    %c0_1 = arith.constant 0 : index
    %3 = vector.load %arg1[%c0, %c0_1] : memref<8x16xf32, #tpu.memory_space<vmem>>, vector<8x16xf32>
    %cst = arith.constant 2.500000e-01 : f32
    %4 = vector.broadcast %cst : f32 to vector<8x16xf32>
    %5 = arith.mulf %3, %4 : vector<8x16xf32>
    %c0_2 = arith.constant 0 : index
    %c0_3 = arith.constant 0 : index
    %6 = vector.load %arg2[%c0_2, %c0_3] : memref<8x16xf32, #tpu.memory_space<vmem>>, vector<8x16xf32>
    %cst_4 = arith.constant 2.500000e-01 : f32
    %7 = vector.broadcast %cst_4 : f32 to vector<8x16xf32>
    %8 = arith.mulf %6, %7 : vector<8x16xf32>
    %9 = tpu.iota {dimensions = array<i32: 0>} : vector<8x1xi32>
    %c8_i32 = arith.constant 8 : i32
    %10 = arith.muli %arg0, %c8_i32 : i32
    %11 = vector.broadcast %10 : i32 to vector<8x1xi32>
    %12 = arith.addi %9, %11 : vector<8x1xi32>
    %c8_i32_5 = arith.constant 8 : i32
    %13 = vector.broadcast %c8_i32_5 : i32 to vector<8x1xi32>
    %14 = arith.cmpi slt, %12, %13 : vector<8x1xi32>
    %cst_6 = arith.constant -1.000000e+30 : f32
    %15 = vector.shape_cast %14 : vector<8x1xi1> to vector<8x1xi1>
    %16 = vector.broadcast %15 : vector<8x1xi1> to vector<8x16xi1>
    %17 = vector.broadcast %cst_6 : f32 to vector<8x16xf32>
    %18 = arith.select %16, %5, %17 : vector<8x16xi1>, vector<8x16xf32>
    %cst_7 = arith.constant -1.000000e+30 : f32
    %19 = vector.shape_cast %14 : vector<8x1xi1> to vector<8x1xi1>
    %20 = vector.broadcast %19 : vector<8x1xi1> to vector<8x16xi1>
    %21 = vector.broadcast %cst_7 : f32 to vector<8x16xf32>
    %22 = arith.select %20, %8, %21 : vector<8x16xi1>, vector<8x16xf32>
    %cst_8 = arith.constant dense<0xFF800000> : vector<8xf32>
    %23 = vector.multi_reduction <maximumf>, %18, %cst_8 [1] : vector<8x16xf32> to vector<8xf32>
    %24 = vector.shape_cast %23 : vector<8xf32> to vector<8x1xf32>
    %25 = vector.broadcast %24 : vector<8x1xf32> to vector<8x16xf32>
    %26 = arith.subf %18, %25 : vector<8x16xf32>
    %27 = math.exp %26 : vector<8x16xf32>
    %cst_9 = arith.constant dense<0xFF800000> : vector<8xf32>
    %28 = vector.multi_reduction <maximumf>, %22, %cst_9 [1] : vector<8x16xf32> to vector<8xf32>
    %29 = vector.shape_cast %28 : vector<8xf32> to vector<8x1xf32>
    %30 = vector.broadcast %29 : vector<8x1xf32> to vector<8x16xf32>
    %31 = arith.subf %22, %30 : vector<8x16xf32>
    %32 = math.exp %31 : vector<8x16xf32>
    %cst_10 = arith.constant dense<0.000000e+00> : vector<8xf32>
    %33 = vector.multi_reduction <add>, %27, %cst_10 [1] : vector<8x16xf32> to vector<8xf32>
    %34 = vector.shape_cast %33 : vector<8xf32> to vector<8x1xf32>
    %35 = tpu.reciprocal %34 : vector<8x1xf32> -> vector<8x1xf32>
    %36 = vector.broadcast %35 : vector<8x1xf32> to vector<8x16xf32>
    %37 = arith.mulf %27, %36 : vector<8x16xf32>
    %cst_11 = arith.constant dense<0.000000e+00> : vector<8xf32>
    %38 = vector.multi_reduction <add>, %32, %cst_11 [1] : vector<8x16xf32> to vector<8xf32>
    %39 = vector.shape_cast %38 : vector<8xf32> to vector<8x1xf32>
    %40 = tpu.reciprocal %39 : vector<8x1xf32> -> vector<8x1xf32>
    %41 = vector.broadcast %40 : vector<8x1xf32> to vector<8x16xf32>
    %42 = arith.mulf %32, %41 : vector<8x16xf32>
    %cst_12 = arith.constant 0.000000e+00 : f32
    %43 = vector.shape_cast %14 : vector<8x1xi1> to vector<8x1xi1>
    %44 = vector.broadcast %43 : vector<8x1xi1> to vector<8x16xi1>
    %45 = vector.broadcast %cst_12 : f32 to vector<8x16xf32>
    %46 = arith.select %44, %37, %45 : vector<8x16xi1>, vector<8x16xf32>
    %cst_13 = arith.constant 0.000000e+00 : f32
    %47 = vector.shape_cast %14 : vector<8x1xi1> to vector<8x1xi1>
    %48 = vector.broadcast %47 : vector<8x1xi1> to vector<8x16xi1>
    %49 = vector.broadcast %cst_13 : f32 to vector<8x16xf32>
    %50 = arith.select %48, %42, %49 : vector<8x16xi1>, vector<8x16xf32>
    %cst_14 = arith.constant 6.250000e-02 : f32
    %51 = vector.broadcast %cst_14 : f32 to vector<8x16xf32>
    %52 = arith.subf %46, %51 : vector<8x16xf32>
    %cst_15 = arith.constant 0.000000e+00 : f32
    %53 = vector.shape_cast %14 : vector<8x1xi1> to vector<8x1xi1>
    %54 = vector.broadcast %53 : vector<8x1xi1> to vector<8x16xi1>
    %55 = vector.broadcast %cst_15 : f32 to vector<8x16xf32>
    %56 = arith.select %54, %52, %55 : vector<8x16xi1>, vector<8x16xf32>
    %cst_16 = arith.constant 6.250000e-02 : f32
    %57 = vector.broadcast %cst_16 : f32 to vector<8x16xf32>
    %58 = arith.subf %50, %57 : vector<8x16xf32>
    %cst_17 = arith.constant 0.000000e+00 : f32
    %59 = vector.shape_cast %14 : vector<8x1xi1> to vector<8x1xi1>
    %60 = vector.broadcast %59 : vector<8x1xi1> to vector<8x16xi1>
    %61 = vector.broadcast %cst_17 : f32 to vector<8x16xf32>
    %62 = arith.select %60, %58, %61 : vector<8x16xi1>, vector<8x16xf32>
    %63 = arith.mulf %56, %62 : vector<8x16xf32>
    %cst_18 = arith.constant dense<0.000000e+00> : vector<8xf32>
    %64 = vector.multi_reduction <add>, %63, %cst_18 [1] : vector<8x16xf32> to vector<8xf32>
    %65 = vector.shape_cast %64 : vector<8xf32> to vector<8x1xf32>
    %66 = arith.mulf %56, %56 : vector<8x16xf32>
    %cst_19 = arith.constant dense<0.000000e+00> : vector<8xf32>
    %67 = vector.multi_reduction <add>, %66, %cst_19 [1] : vector<8x16xf32> to vector<8xf32>
    %68 = vector.shape_cast %67 : vector<8xf32> to vector<8x1xf32>
    %69 = math.sqrt %68 : vector<8x1xf32>
    %70 = arith.mulf %62, %62 : vector<8x16xf32>
    %cst_20 = arith.constant dense<0.000000e+00> : vector<8xf32>
    %71 = vector.multi_reduction <add>, %70, %cst_20 [1] : vector<8x16xf32> to vector<8xf32>
    %72 = vector.shape_cast %71 : vector<8xf32> to vector<8x1xf32>
    %73 = math.sqrt %72 : vector<8x1xf32>
    %74 = arith.mulf %69, %73 : vector<8x1xf32>
    %cst_21 = arith.constant 9.99999993E-9 : f32
    %75 = vector.broadcast %cst_21 : f32 to vector<8x1xf32>
    %76 = arith.addf %74, %75 : vector<8x1xf32>
    %77 = arith.divf %65, %76 : vector<8x1xf32>
    %cst_22 = arith.constant 0.000000e+00 : f32
    %78 = vector.broadcast %cst_22 : f32 to vector<8x1xf32>
    %79 = arith.select %14, %77, %78 : vector<8x1xi1>, vector<8x1xf32>
    %c0_23 = arith.constant 0 : index
    %c0_24 = arith.constant 0 : index
    %80 = vector.load %arg4[%c0_23, %c0_24] : memref<1x1xf32, #tpu.memory_space<vmem>>, vector<1x1xf32>
    %81 = vector.shape_cast %79 : vector<8x1xf32> to vector<1x8x1xf32>
    %cst_25 = arith.constant dense<0.000000e+00> : vector<1xf32>
    %82 = vector.multi_reduction <add>, %81, %cst_25 [1, 2] : vector<1x8x1xf32> to vector<1xf32>
    %83 = vector.shape_cast %82 : vector<1xf32> to vector<1x1x1xf32>
    %84 = vector.extract %83[0, 0, 0] : f32 from vector<1x1x1xf32>
    %85 = vector.broadcast %84 : f32 to vector<1x1xf32>
    %86 = arith.addf %80, %85 : vector<1x1xf32>
    %c0_26 = arith.constant 0 : index
    %c0_27 = arith.constant 0 : index
    %87 = vector.load %arg4[%c0_26, %c0_27] : memref<1x1xf32, #tpu.memory_space<vmem>>, vector<1x1xf32>
    tpu.vector_store %arg4[%c0_26, %c0_27], %86 {strides = array<i32>} : memref<1x1xf32, #tpu.memory_space<vmem>>, vector<1x1xf32>,
    %c0_28 = arith.constant 0 : index
    %c0_29 = arith.constant 0 : index
    %88 = vector.load %arg5[%c0_28, %c0_29] : memref<1x16xf32, #tpu.memory_space<vmem>>, vector<1x16xf32>
    %cst_30 = arith.constant dense<0.000000e+00> : vector<16xf32>
    %89 = vector.multi_reduction <add>, %46, %cst_30 [0] : vector<8x16xf32> to vector<16xf32>
    %90 = vector.shape_cast %89 : vector<16xf32> to vector<1x16xf32>
    %91 = arith.addf %88, %90 : vector<1x16xf32>
    %c0_31 = arith.constant 0 : index
    %c0_32 = arith.constant 0 : index
    %92 = vector.load %arg5[%c0_31, %c0_32] : memref<1x16xf32, #tpu.memory_space<vmem>>, vector<1x16xf32>
    tpu.vector_store %arg5[%c0_31, %c0_32], %91 {strides = array<i32>} : memref<1x16xf32, #tpu.memory_space<vmem>>, vector<1x16xf32>,
    %c0_33 = arith.constant 0 : index
    %c0_34 = arith.constant 0 : index
    %93 = vector.load %arg6[%c0_33, %c0_34] : memref<1x16xf32, #tpu.memory_space<vmem>>, vector<1x16xf32>
    %cst_35 = arith.constant dense<0.000000e+00> : vector<16xf32>
    %94 = vector.multi_reduction <add>, %50, %cst_35 [0] : vector<8x16xf32> to vector<16xf32>
    %95 = vector.shape_cast %94 : vector<16xf32> to vector<1x16xf32>
    %96 = arith.addf %93, %95 : vector<1x16xf32>
    %c0_36 = arith.constant 0 : index
    %c0_37 = arith.constant 0 : index
    %97 = vector.load %arg6[%c0_36, %c0_37] : memref<1x16xf32, #tpu.memory_space<vmem>>, vector<1x16xf32>
    tpu.vector_store %arg6[%c0_36, %c0_37], %96 {strides = array<i32>} : memref<1x16xf32, #tpu.memory_space<vmem>>, vector<1x16xf32>,
    %c0_38 = arith.constant 0 : index
    %c0_39 = arith.constant 0 : index
    %98 = vector.load %arg7[%c0_38, %c0_39] : memref<1x16xf32, #tpu.memory_space<vmem>>, vector<1x16xf32>
    %99 = arith.mulf %46, %50 : vector<8x16xf32>
    %cst_40 = arith.constant dense<0.000000e+00> : vector<16xf32>
    %100 = vector.multi_reduction <add>, %99, %cst_40 [0] : vector<8x16xf32> to vector<16xf32>
    %101 = vector.shape_cast %100 : vector<16xf32> to vector<1x16xf32>
    %102 = arith.addf %98, %101 : vector<1x16xf32>
    %c0_41 = arith.constant 0 : index
    %c0_42 = arith.constant 0 : index
    %103 = vector.load %arg7[%c0_41, %c0_42] : memref<1x16xf32, #tpu.memory_space<vmem>>, vector<1x16xf32>
    tpu.vector_store %arg7[%c0_41, %c0_42], %102 {strides = array<i32>} : memref<1x16xf32, #tpu.memory_space<vmem>>, vector<1x16xf32>,
    %c0_43 = arith.constant 0 : index
    %c0_44 = arith.constant 0 : index
    %104 = vector.load %arg8[%c0_43, %c0_44] : memref<1x16xf32, #tpu.memory_space<vmem>>, vector<1x16xf32>
    %105 = arith.mulf %46, %46 : vector<8x16xf32>
    %cst_45 = arith.constant dense<0.000000e+00> : vector<16xf32>
    %106 = vector.multi_reduction <add>, %105, %cst_45 [0] : vector<8x16xf32> to vector<16xf32>
    %107 = vector.shape_cast %106 : vector<16xf32> to vector<1x16xf32>
    %108 = arith.addf %104, %107 : vector<1x16xf32>
    %c0_46 = arith.constant 0 : index
    %c0_47 = arith.constant 0 : index
    %109 = vector.load %arg8[%c0_46, %c0_47] : memref<1x16xf32, #tpu.memory_space<vmem>>, vector<1x16xf32>
    tpu.vector_store %arg8[%c0_46, %c0_47], %108 {strides = array<i32>} : memref<1x16xf32, #tpu.memory_space<vmem>>, vector<1x16xf32>,
    %c0_48 = arith.constant 0 : index
    %c0_49 = arith.constant 0 : index
    %110 = vector.load %arg9[%c0_48, %c0_49] : memref<1x16xf32, #tpu.memory_space<vmem>>, vector<1x16xf32>
    %111 = arith.mulf %50, %50 : vector<8x16xf32>
    %cst_50 = arith.constant dense<0.000000e+00> : vector<16xf32>
    %112 = vector.multi_reduction <add>, %111, %cst_50 [0] : vector<8x16xf32> to vector<16xf32>
    %113 = vector.shape_cast %112 : vector<16xf32> to vector<1x16xf32>
    %114 = arith.addf %110, %113 : vector<1x16xf32>
    %c0_51 = arith.constant 0 : index
    %c0_52 = arith.constant 0 : index
    %115 = vector.load %arg9[%c0_51, %c0_52] : memref<1x16xf32, #tpu.memory_space<vmem>>, vector<1x16xf32>
    tpu.vector_store %arg9[%c0_51, %c0_52], %114 {strides = array<i32>} : memref<1x16xf32, #tpu.memory_space<vmem>>, vector<1x16xf32>,
    %c0_i32_53 = arith.constant 0 : i32
    %116 = arith.cmpi eq, %arg0, %c0_i32_53 : i32
    %117 = arith.extui %116 : i1 to i32
    %cst_54 = arith.constant 9.99999993E-9 : f32
    %cst_55 = arith.constant 6.250000e-02 : f32
    %c0_i32_56 = arith.constant 0 : i32
    %118 = arith.cmpi ne, %117, %c0_i32_56 : i32
    scf.if %118 {
      %c0_57 = arith.constant 0 : index
      %c0_58 = arith.constant 0 : index
      %119 = vector.load %arg5[%c0_57, %c0_58] : memref<1x16xf32, #tpu.memory_space<vmem>>, vector<1x16xf32>
      %c0_59 = arith.constant 0 : index
      %c0_60 = arith.constant 0 : index
      %120 = vector.load %arg6[%c0_59, %c0_60] : memref<1x16xf32, #tpu.memory_space<vmem>>, vector<1x16xf32>
      %c0_61 = arith.constant 0 : index
      %c0_62 = arith.constant 0 : index
      %121 = vector.load %arg7[%c0_61, %c0_62] : memref<1x16xf32, #tpu.memory_space<vmem>>, vector<1x16xf32>
      %122 = arith.mulf %119, %120 : vector<1x16xf32>
      %cst_63 = arith.constant 1.250000e-01 : f32
      %123 = vector.broadcast %cst_63 : f32 to vector<1x16xf32>
      %124 = arith.mulf %122, %123 : vector<1x16xf32>
      %125 = arith.subf %121, %124 : vector<1x16xf32>
      %c0_64 = arith.constant 0 : index
      %c0_65 = arith.constant 0 : index
      %126 = vector.load %arg8[%c0_64, %c0_65] : memref<1x16xf32, #tpu.memory_space<vmem>>, vector<1x16xf32>
      %127 = arith.mulf %119, %119 : vector<1x16xf32>
      %cst_66 = arith.constant 1.250000e-01 : f32
      %128 = vector.broadcast %cst_66 : f32 to vector<1x16xf32>
      %129 = arith.mulf %127, %128 : vector<1x16xf32>
      %130 = arith.subf %126, %129 : vector<1x16xf32>
      %cst_67 = arith.constant 0.000000e+00 : f32
      %131 = vector.broadcast %cst_67 : f32 to vector<1x16xf32>
      %132 = arith.maximumf %130, %131 : vector<1x16xf32>
      %c0_68 = arith.constant 0 : index
      %c0_69 = arith.constant 0 : index
      %133 = vector.load %arg9[%c0_68, %c0_69] : memref<1x16xf32, #tpu.memory_space<vmem>>, vector<1x16xf32>
      %134 = arith.mulf %120, %120 : vector<1x16xf32>
      %cst_70 = arith.constant 1.250000e-01 : f32
      %135 = vector.broadcast %cst_70 : f32 to vector<1x16xf32>
      %136 = arith.mulf %134, %135 : vector<1x16xf32>
      %137 = arith.subf %133, %136 : vector<1x16xf32>
      %cst_71 = arith.constant 0.000000e+00 : f32
      %138 = vector.broadcast %cst_71 : f32 to vector<1x16xf32>
      %139 = arith.maximumf %137, %138 : vector<1x16xf32>
      %140 = math.sqrt %132 : vector<1x16xf32>
      %141 = math.sqrt %139 : vector<1x16xf32>
      %142 = arith.mulf %140, %141 : vector<1x16xf32>
      %143 = vector.broadcast %cst_54 : f32 to vector<1x16xf32>
      %144 = arith.addf %142, %143 : vector<1x16xf32>
      %145 = arith.divf %125, %144 : vector<1x16xf32>
      %146 = vector.shape_cast %145 : vector<1x16xf32> to vector<1x1x16xf32>
      %cst_72 = arith.constant dense<0.000000e+00> : vector<1xf32>
      %147 = vector.multi_reduction <add>, %146, %cst_72 [1, 2] : vector<1x1x16xf32> to vector<1xf32>
      %148 = vector.shape_cast %147 : vector<1xf32> to vector<1x1x1xf32>
      %149 = vector.extract %148[0, 0, 0] : f32 from vector<1x1x1xf32>
      %150 = vector.broadcast %149 : f32 to vector<1x1xf32>
      %151 = vector.broadcast %cst_55 : f32 to vector<1x1xf32>
      %152 = arith.mulf %150, %151 : vector<1x1xf32>
      %cst_73 = arith.constant 1.000000e+00 : f32
      %153 = vector.broadcast %cst_73 : f32 to vector<1x1xf32>
      %154 = arith.subf %153, %152 : vector<1x1xf32>
      %c0_74 = arith.constant 0 : index
      %c0_75 = arith.constant 0 : index
      %155 = vector.load %arg4[%c0_74, %c0_75] : memref<1x1xf32, #tpu.memory_space<vmem>>, vector<1x1xf32>
      %cst_76 = arith.constant 1.250000e-01 : f32
      %156 = vector.broadcast %cst_76 : f32 to vector<1x1xf32>
      %157 = arith.mulf %155, %156 : vector<1x1xf32>
      %cst_77 = arith.constant 1.000000e+00 : f32
      %158 = vector.broadcast %cst_77 : f32 to vector<1x1xf32>
      %159 = arith.subf %158, %157 : vector<1x1xf32>
      %cst_78 = arith.constant 1.000000e+00 : f32
      %160 = vector.broadcast %cst_78 : f32 to vector<1x1xf32>
      %161 = arith.mulf %160, %159 : vector<1x1xf32>
      %cst_79 = arith.constant 1.000000e+00 : f32
      %162 = vector.broadcast %cst_79 : f32 to vector<1x1xf32>
      %163 = arith.mulf %162, %154 : vector<1x1xf32>
      %164 = arith.addf %161, %163 : vector<1x1xf32>
      %cst_80 = arith.constant 1.600000e+01 : f32
      %165 = vector.broadcast %cst_80 : f32 to vector<1x1xf32>
      %166 = arith.mulf %165, %164 : vector<1x1xf32>
      %167 = vector.extract %166[0, 0] : f32 from vector<1x1xf32>
      %c0_81 = arith.constant 0 : index
      %168 = memref.load %arg3[%c0_81] : memref<1xf32, #tpu.memory_space<smem>>
      memref.store %167, %arg3[%c0_81] : memref<1xf32, #tpu.memory_space<smem>>
    } else {
    }
    return
  }
  func.func @transform_0(%arg0: i32) -> (i32, i32) {
    %c0_i32 = arith.constant 0 : i32
    %c0_i32_0 = arith.constant 0 : i32
    return %arg0, %c0_i32 : i32, i32
  }
  func.func @transform_1(%arg0: i32) -> (i32, i32) {
    %c0_i32 = arith.constant 0 : i32
    %c0_i32_0 = arith.constant 0 : i32
    return %arg0, %c0_i32 : i32, i32
  }
  func.func @transform_2(%arg0: i32) -> i32 {
    %c0_i32 = arith.constant 0 : i32
    %c0_i32_0 = arith.constant 0 : i32
    return %c0_i32 : i32
  }
}

</mosaic_0001>

<bundles_post_ra>
// kernel: tpu_custom_call.1
= control target key start
LH: loop header
LB: loop body
LE: loop exit
PB: predicated region body
PF: predicated region fallthrough
CT: control target
= control target key end

     0   :  { %7 = vsyncpa [#allocation9], 0  ;;  %s443_s0 = inlined_call_operand.hbm [shape: f32[8,16], index: 0, kind: input, shape index: {}]   ;;  %s444_s1 = inlined_call_operand.hbm [shape: f32[8,16], index: 1, kind: input, shape index: {}]   ;;  %s445_s2 = inlined_call_operand.hbm [shape: f32[1], index: 2, kind: output, shape index: {}]  }
   0x1   :  { %8 = vsyncpa [#allocation12], 0 }
   0x2   :  { %9 = vsyncpa [#allocation10], 0  ;;  %s357_s9 = smov [#allocation8]   ;;  %s358_s11 = smov [#allocation11]  }
   0x3   :  { %s16_s10 = sshll.u32 %s357_s9, 4  ;;  %s26_s12 = sshll.u32 %s358_s11, 4  ;;  %s17_s10 = int_to_ptr.vmem [resolvable:$true] %s16_s10  ;;  %s27_s12 = int_to_ptr.vmem [resolvable:$true] %s26_s12 }
   0x4   :  { %s297_s15 = scalar_lea.hbm %s443_s0, 128 }
   0x5   :  { %p298_p0 = scmp.ne.s32.totalorder %s443_s0, %s297_s15  ;;  %p301_p1 = scmp.lt.u32.totalorder %s297_s15, %s443_s0 }
   0x7   :  { %p303_p2 = pnand %p301_p1, %p298_p0 }
   0x9   :  { %306 = shalt.err (!%p303_p2)
}
   0xa   :  { %s307_s20 = scalar_lea.vmem %s17_s10, 128  ;;  %p312_p4 = scmp.lt.s32.totalorder %s17_s10, %s17_s10 }
   0xb   :  { %p308_p3 = scmp.ne.s32.totalorder %s17_s10, %s307_s20  ;;  %p313_p5 = scmp.lt.s32.totalorder %s307_s20, %s307_s20 }
   0xd   :  { %p314_p6 = por %p313_p5, %p312_p4 }
   0xf   :  { %p315_p7 = pnand %p314_p6, %p308_p3 }
  0x11   :  { %318 = shalt.err (!%p315_p7)
}
  0x12   :  { %19 = dma.hbm_to_vmem [thread:$0]  %s443_s0, 128, %s17_s10, [#allocation9]  }
  0x13   :  { %s319_s25 = scalar_lea.hbm %s444_s1, 128 }
  0x14   :  { %p320_p8 = scmp.ne.s32.totalorder %s444_s1, %s319_s25  ;;  %p323_p9 = scmp.lt.u32.totalorder %s319_s25, %s444_s1 }
  0x16   :  { %p325_p10 = pnand %p323_p9, %p320_p8 }
  0x18   :  { %328 = shalt.err (!%p325_p10)
}
  0x19   :  { %s329_s30 = scalar_lea.vmem %s27_s12, 128  ;;  %p334_p12 = scmp.lt.s32.totalorder %s27_s12, %s27_s12 }
  0x1a   :  { %p330_p11 = scmp.ne.s32.totalorder %s27_s12, %s329_s30  ;;  %p335_p13 = scmp.lt.s32.totalorder %s329_s30, %s329_s30 }
  0x1c   :  { %p336_p0 = por %p335_p13, %p334_p12 }
  0x1e   :  { %p337_p1 = pnand %p336_p0, %p330_p11 }
  0x20   :  { %340 = shalt.err (!%p337_p1)
}
  0x21   :  { %29 = dma.hbm_to_vmem [thread:$0]  %s444_s1, 128, %s27_s12, [#allocation12]  }
  0x22   :  { %351 = dma.done.wait [#allocation9], 128  }
  0x23   :  { %352 = vsyncadd [#allocation9], 4294967168 }
  0x24   :  { %353 = dma.done.wait [#allocation12], 128  }
  0x25   :  { %354 = vsyncadd [#allocation12], 4294967168  ;;  %v48_v0 = vld [vmem:[#allocation8] sm:$0xff]  ;;  %vm62_vm0 = vcmask 130048   ;;  %v50_v1 = vld [vmem:[#allocation11] sm:$0xff]  ;;  %vm42_vm1 = vcmask 122880  }
  0x26   :  { %v49_v2 = vmul.f32 0.25, %v48_v0  ;;  %v51_v3 = vmul.f32 0.25, %v50_v1  ;;  %v359_v6 = vmov 0.0   ;;  %vm123_vm10 = vcmask 7168   ;;  %s341_s8 = scalar_lea.hbm %s445_s2, 16 }
  0x27   :  { %43 = vst.msk [vmem:[#allocation3] sm:$0x1] %vm42_vm1, %v359_v6  ;;  %46 = vst.msk [vmem:[#allocation6] sm:$0x1] %vm42_vm1, %v359_v6  ;;  %vm40_vm11 = vcmask 0   ;;  %p342_p2 = scmp.ne.s32.totalorder %s445_s2, %s341_s8  ;;  %p345_p3 = scmp.lt.u32.totalorder %s341_s8, %s445_s2 }
  0x28   :  { %v63_v4 = vsel %vm62_vm0, %v49_v2, -inf  ;;  %v69_v5 = vsel %vm62_vm0, %v51_v3, -inf  ;;  %44 = vst.msk [vmem:[#allocation4] sm:$0x1] %vm42_vm1, %v359_v6  ;;  %45 = vst.msk [vmem:[#allocation5] sm:$0x1] %vm42_vm1, %v359_v6 }
  0x29   :  { %64 = vmax.xlane.f32.xlu0 %v63_v4  ;;  %47 = vst.msk [vmem:[#allocation7] sm:$0x1] %vm42_vm1, %v359_v6  ;;  %p347_p4 = pnand %p345_p3, %p342_p2 }
  0x2a   :  { %41 = vst.msk [vmem:[#allocation2] sm:$0x1] %vm40_vm11, %v359_v6 }
  0x2d   :  { %70 = vmax.xlane.f32.xlu0 %v69_v5 }
  0x2e   :  { %v138_v52 = vld [vmem:[#allocation3] sm:$0x1]  ;;  %v170_v60 = vld [vmem:[#allocation6] sm:$0x1] }
  0xb6   :  { %v65_v7 = vpop.xlane.xlu0 %64 }
  0xb7   :  { %v66_v8 = vsub.f32 %v49_v2, %v65_v7  ;;  %v149_v2 = vld [vmem:[#allocation4] sm:$0x1] }
  0xb9   :  { %v67_v9 = vmul.f32 1.442695, %v66_v8  ;;  %v159_v8 = vld [vmem:[#allocation5] sm:$0x1] }
  0xba   :  { %v71_v10 = vpop.xlane.xlu0 %70 }
  0xbb   :  { %277 = vpow2.f32 %v67_v9  ;;  %v72_v11 = vsub.f32 %v51_v3, %v71_v10 }
  0xbd   :  { %v73_v12 = vmul.f32 1.442695, %v72_v11 }
  0xbf   :  { %279 = vpow2.f32 %v73_v12  ;;  %v181_v12 = vld [vmem:[#allocation7] sm:$0x1] }
  0xc5   :  { %v278_v13 = vpop.eup %277 }
  0xc6   :  { %v75_v14 = vsel %vm62_vm0, %v278_v13, 0.0 }
  0xc7   :  { %76 = vadd.xlane.f32.xlu1 %v75_v14 }
  0xc9   :  { %v280_v15 = vpop.eup %279 }
  0xca   :  { %v80_v16 = vsel %vm62_vm0, %v280_v15, 0.0 }
  0xcb   :  { %81 = vadd.xlane.f32.xlu1 %v80_v16 }
 0x154   :  { %v77_v17 = vpop.xlane.xlu1 %76 }
 0x155   :  { %281 = vrcp.f32 %v77_v17 }
 0x158   :  { %v82_v18 = vpop.xlane.xlu1 %81 }
 0x159   :  { %283 = vrcp.f32 %v82_v18 }
 0x15f   :  { %v282_v19 = vpop.eup %281 }
 0x160   :  { %v79_v20 = vmul.f32 %v282_v19, %v278_v13 }
 0x162   :  { %v139_v21 = vsel %vm62_vm0, %v79_v20, 0.0  ;;  %v171_v22 = vmul.f32 %v79_v20, %v79_v20  ;;  %v265_v23 = vadd.f32 -0.0625, %v79_v20 }
 0x163   :  { %v284_v24 = vpop.eup %283  ;;  %v140_v25 = vrot.slane %v139_v21, 4 }
 0x164   :  { %v172_v26 = vsel %vm62_vm0, %v171_v22, 0.0  ;;  %v84_v27 = vmul.f32 %v284_v24, %v280_v15  ;;  %v95_v28 = vmul.f32 %v265_v23, %v265_v23 }
 0x165   :  { %v141_v29 = vadd.f32 %v140_v25, %v139_v21  ;;  %v173_v30 = vrot.slane %v172_v26, 4 }
 0x166   :  { %v150_v31 = vsel %vm62_vm0, %v84_v27, 0.0  ;;  %v160_v32 = vmul.f32 %v84_v27, %v79_v20  ;;  %v182_v33 = vmul.f32 %v84_v27, %v84_v27  ;;  %v96_v34 = vsel %vm62_vm0, %v95_v28, 0.0 }
 0x167   :  { %v142_v35 = vrot.slane %v141_v29, 2  ;;  %v174_v36 = vadd.f32 %v173_v30, %v172_v26  ;;  %v151_v37 = vrot.slane %v150_v31, 4  ;;  %97 = vadd.xlane.f32.xlu0 %v96_v34  ;;  %v266_v38 = vadd.f32 -0.0625, %v84_v27 }
 0x168   :  { %v161_v39 = vsel %vm62_vm0, %v160_v32, 0.0  ;;  %v183_v40 = vsel %vm62_vm0, %v182_v33, 0.0 }
 0x169   :  { %v143_v41 = vadd.f32 %v142_v35, %v141_v29  ;;  %v175_v42 = vrot.slane %v174_v36, 2  ;;  %v152_v43 = vadd.f32 %v151_v37, %v150_v31  ;;  %v162_v44 = vrot.slane %v161_v39, 4 }
 0x16a   :  { %v184_v45 = vrot.slane %v183_v40, 4  ;;  %v106_v46 = vmul.f32 %v266_v38, %v266_v38  ;;  %v91_v47 = vmul.f32 %v266_v38, %v265_v23 }
 0x16b   :  { %v144_v48 = vrot.slane %v143_v41, 1  ;;  %v176_v49 = vadd.f32 %v175_v42, %v174_v36  ;;  %v153_v50 = vrot.slane %v152_v43, 2  ;;  %v163_v51 = vadd.f32 %v162_v44, %v161_v39 }
 0x16c   :  { %v185_v53 = vadd.f32 %v184_v45, %v183_v40  ;;  %v107_v54 = vsel %vm62_vm0, %v106_v46, 0.0  ;;  %v92_v55 = vsel %vm62_vm0, %v91_v47, 0.0 }
 0x16d   :  { %v145_v56 = vadd.f32 %v144_v48, %v143_v41  ;;  %v177_v57 = vrot.slane %v176_v49, 1  ;;  %v154_v58 = vadd.f32 %v153_v50, %v152_v43  ;;  %v164_v59 = vrot.slane %v163_v51, 2  ;;  %108 = vadd.xlane.f32.xlu1 %v107_v54  ;;  %93 = vadd.xlane.f32.xlu0 %v92_v55 }
 0x16e   :  { %v186_v61 = vrot.slane %v185_v53, 2 }
 0x16f   :  { %v146_v62 = vadd.f32 %v145_v56, %v138_v52  ;;  %v178_v63 = vadd.f32 %v177_v57, %v176_v49  ;;  %v155_v0 = vrot.slane %v154_v58, 1  ;;  %v165_v1 = vadd.f32 %v164_v59, %v163_v51 }
 0x170   :  { %v187_v3 = vadd.f32 %v186_v61, %v185_v53 }
 0x171   :  { %148 = vst.msk [vmem:[#allocation3] sm:$0x1] %vm42_vm1, %v146_v62  ;;  %v179_v4 = vadd.f32 %v178_v63, %v170_v60  ;;  %v156_v5 = vadd.f32 %v155_v0, %v154_v58  ;;  %v166_v7 = vrot.slane %v165_v1, 1 }
 0x172   :  { %v188_v9 = vrot.slane %v187_v3, 1 }
 0x173   :  { %180 = vst.msk [vmem:[#allocation6] sm:$0x1] %vm42_vm1, %v179_v4  ;;  %v157_v10 = vadd.f32 %v156_v5, %v149_v2  ;;  %v167_v11 = vadd.f32 %v166_v7, %v165_v1 }
 0x174   :  { %v189_v13 = vadd.f32 %v188_v9, %v187_v3 }
 0x175   :  { %158 = vst.msk [vmem:[#allocation4] sm:$0x1] %vm42_vm1, %v157_v10  ;;  %v168_v14 = vadd.f32 %v167_v11, %v159_v8 }
 0x176   :  { %v190_v15 = vadd.f32 %v189_v13, %v181_v12 }
 0x177   :  { %169 = vst.msk [vmem:[#allocation5] sm:$0x1] %vm42_vm1, %v168_v14 }
 0x178   :  { %191 = vst.msk [vmem:[#allocation7] sm:$0x1] %vm42_vm1, %v190_v15  ;;  %v195_v16 = vld [vmem:[#allocation3] sm:$0x1] }
 0x179   :  { %v202_v17 = vmul.f32 %v195_v16, %v195_v16 }
 0x17a   :  { %v201_v20 = vld [vmem:[#allocation6] sm:$0x1] }
 0x17b   :  { %v203_v18 = vmul.f32 0.125, %v202_v17 }
 0x17c   :  { %v196_v19 = vld [vmem:[#allocation4] sm:$0x1] }
 0x17d   :  { %v204_v21 = vsub.f32 %v201_v20, %v203_v18  ;;  %v207_v22 = vmul.f32 %v196_v19, %v196_v19  ;;  %v198_v40 = vmul.f32 %v196_v19, %v195_v16  ;;  %v122_v16 = vld [vmem:[#allocation2] sm:$0x1] }
 0x17e   :  { %v197_v42 = vld [vmem:[#allocation5] sm:$0x1] }
 0x17f   :  { %v205_v23 = vmax.f32 %v204_v21, 0.0  ;;  %v208_v24 = vmul.f32 0.125, %v207_v22  ;;  %v206_v25 = vld [vmem:[#allocation7] sm:$0x1]  ;;  %v199_v41 = vmul.f32 0.125, %v198_v40 }
 0x181   :  { %v209_v26 = vsub.f32 %v206_v25, %v208_v24  ;;  %285 = vrsqrt.f32 %v205_v23  ;;  %vm213_vm2 = vcmp.eq.f32.partialorder %v205_v23, inf  ;;  %v216_v33 = vand.u32 2147483648, %v205_v23 }
 0x182   :  { %vm215_vm4 = vcmp.eq.f32.partialorder %v205_v23, 0.0  ;;  %v200_v43 = vsub.f32 %v197_v42, %v199_v41 }
 0x183   :  { %v210_v27 = vmax.f32 %v209_v26, 0.0 }
 0x185   :  { %287 = vrsqrt.f32 %v210_v27  ;;  %vm220_vm3 = vcmp.eq.f32.partialorder %v210_v27, inf  ;;  %v223_v34 = vand.u32 2147483648, %v210_v27  ;;  %vm222_vm5 = vcmp.eq.f32.partialorder %v210_v27, 0.0 }
 0x18b   :  { %v286_v28 = vpop.eup %285 }
 0x18c   :  { %v212_v29 = vmul.f32 %v286_v28, %v205_v23 }
 0x18e   :  { %v214_v31 = vsel %vm213_vm2, %v205_v23, %v212_v29 }
 0x18f   :  { %v288_v30 = vpop.eup %287  ;;  %v217_v36 = vsel %vm215_vm4, %v216_v33, %v214_v31 }
 0x190   :  { %v219_v32 = vmul.f32 %v288_v30, %v210_v27 }
 0x192   :  { %v221_v35 = vsel %vm220_vm3, %v210_v27, %v219_v32 }
 0x193   :  { %v224_v37 = vsel %vm222_vm5, %v223_v34, %v221_v35 }
 0x194   :  { %v225_v38 = vmul.f32 %v224_v37, %v217_v36 }
 0x196   :  { %v226_v39 = vadd.f32 1e-08, %v225_v38 }
 0x198   :  { %289 = vrcp.f32 %v226_v39 }
 0x1a2   :  { %v290_v44 = vpop.eup %289 }
 0x1a3   :  { %v228_v45 = vmul.f32 %v290_v44, %v200_v43 }
 0x1a5   :  { %v229_v46 = vsel %vm42_vm1, %v228_v45, 0.0 }
 0x1a6   :  { %230 = vadd.xlane.f32.xlu0 %v229_v46 }
 0x1f4   :  { %v98_v47 = vpop.xlane.xlu0 %97 }
 0x1f5   :  { %291 = vrsqrt.f32 %v98_v47  ;;  %vm101_vm6 = vcmp.eq.f32.partialorder %v98_v47, inf  ;;  %v104_v54 = vand.u32 2147483648, %v98_v47  ;;  %vm103_vm8 = vcmp.eq.f32.partialorder %v98_v47, 0.0 }
 0x1fa   :  { %v109_v48 = vpop.xlane.xlu1 %108  ;;  %v94_v62 = vpop.xlane.xlu0 %93 }
 0x1fb   :  { %293 = vrsqrt.f32 %v109_v48  ;;  %vm112_vm7 = vcmp.eq.f32.partialorder %v109_v48, inf  ;;  %v115_v55 = vand.u32 2147483648, %v109_v48  ;;  %vm114_vm9 = vcmp.eq.f32.partialorder %v109_v48, 0.0 }
 0x1ff   :  { %v292_v49 = vpop.eup %291 }
 0x200   :  { %v100_v50 = vmul.f32 %v292_v49, %v98_v47 }
 0x202   :  { %v102_v52 = vsel %vm101_vm6, %v98_v47, %v100_v50 }
 0x203   :  { %v105_v57 = vsel %vm103_vm8, %v104_v54, %v102_v52 }
 0x205   :  { %v294_v51 = vpop.eup %293 }
 0x206   :  { %v111_v53 = vmul.f32 %v294_v51, %v109_v48 }
 0x208   :  { %v113_v56 = vsel %vm112_vm7, %v109_v48, %v111_v53 }
 0x209   :  { %v116_v58 = vsel %vm114_vm9, %v115_v55, %v113_v56 }
 0x20a   :  { %v117_v59 = vmul.f32 %v116_v58, %v105_v57 }
 0x20c   :  { %v118_v60 = vadd.f32 1e-08, %v117_v59 }
 0x20e   :  { %295 = vrcp.f32 %v118_v60 }
 0x218   :  { %v296_v61 = vpop.eup %295 }
 0x219   :  { %v120_v63 = vmul.f32 %v296_v61, %v94_v62 }
 0x21b   :  { %v124_v0 = vsel %vm123_vm10, %v120_v63, 0.0 }
 0x21c   :  { %125 = vadd.xlane.f32.xlu1 %v124_v0 }
 0x233   :  { %v231_v1 = vpop.xlane.xlu0 %230 }
 0x234   :  { %v232_v2 = vrot.slane %v231_v1, 4 }
 0x236   :  { %v233_v3 = vadd.f32 %v232_v2, %v231_v1 }
 0x238   :  { %v234_v4 = vrot.slane %v233_v3, 2 }
 0x23a   :  { %v235_v9 = vadd.f32 %v234_v4, %v233_v3 }
 0x23c   :  { %v236_v12 = vrot.slane %v235_v9, 1 }
 0x23e   :  { %v237_v15 = vadd.f32 %v236_v12, %v235_v9 }
 0x2a9   :  { %v126_v5 = vpop.xlane.xlu1 %125 }
 0x2aa   :  { %v127_v7 = vrot.slane %v126_v5, 4 }
 0x2ac   :  { %v128_v8 = vadd.f32 %v127_v7, %v126_v5 }
 0x2ae   :  { %v129_v10 = vrot.slane %v128_v8, 2 }
 0x2b0   :  { %v130_v11 = vadd.f32 %v129_v10, %v128_v8 }
 0x2b2   :  { %v131_v13 = vrot.slane %v130_v11, 1 }
 0x2b4   :  { %v132_v14 = vadd.f32 %v131_v13, %v130_v11 }
 0x2b6   :  { %267 = vpush %v132_v14 }
 0x2b7   :  { %269 = vpush %v237_v15 }
 0x2e7   :  { %s268_s1 = spop %267 }
 0x2e8   :  { %v134_v17 = vstv %s268_s1  ;;  %s270_s4 = spop %269 }
 0x2e9   :  { %v135_v6 = vadd.f32 %v134_v17, %v122_v16  ;;  %v239_v18 = vstv %s270_s4 }
 0x2ea   :  { %v240_v19 = vmul.f32 0.0625, %v239_v18 }
 0x2eb   :  { %137 = vst.msk [vmem:[#allocation2] sm:$0x1] %vm40_vm11, %v135_v6 }
 0x2ec   :  { %v241_v22 = vsub.f32 1.0, %v240_v19 }
 0x2f2   :  { %v242_v20 = vld [vmem:[#allocation2] sm:$0x1] }
 0x2f3   :  { %v243_v21 = vmul.f32 0.125, %v242_v20 }
 0x2f5   :  { %v244_v23 = vsub.f32 1.0, %v243_v21 }
 0x2f7   :  { %v245_v24 = vadd.f32 %v244_v23, %v241_v22 }
 0x2f9   :  { %v246_v25 = vmul.f32 16.0, %v245_v24 }
 0x2fb   :  { %271 = vpush %v246_v25 }
 0x32c   :  { %s272_s5 = spop %271 }
 0x32d   :  { %249 = sst [smem:[#allocation13]] %s272_s5 }
 0x32e   :  { %350 = shalt.err (!%p347_p4)
}
 0x32f   :  { %s360_s13 = smov [#allocation13]  }
 0x330   :  { %257 = dma.smem_to_hbm %s360_s13, 16, %s445_s2, [#allocation10]  }
 0x331   :  { %355 = dma.done.wait [#allocation10], 16  }
 0x332   :  { %356 = vsyncadd [#allocation10], 4294967280 }
 0x333   :  { %261 = sfence }
 0x334   :  { %262 = vsyncpa [#allocation9], 1 }
 0x335   :  { %263 = vsyncpa [#allocation12], 1 }
 0x336   :  { %264 = vsyncpa [#allocation10], 1 }

</bundles_post_ra>
